<compile_context>
chip_gen: v7x
topology: tpu7x:2x2x1
jax: 0.10.0
libtpu: 0.0.40
codegen_flags: <defaults>
</compile_context>

<pallas_src>
import functools

import jax
import jax.numpy as jnp
from jax.experimental import pallas as pl
from jax.experimental.pallas import tpu as pltpu

_NEG = -1e30  # finite "-inf" used to neutralize padded class columns


def _cross_entropy_kernel(x_ref, t_ref, wy_ref, loss_ref,
                          m_sc, l_sc, xy_sc,
                          *, tc, c_total, chunked, need_mask):
    """One (row-tile, class-chunk) grid step of weighted cross-entropy.

    Keeps per-row online-logsumexp state (m, l) and the gathered target logit
    (x_y) in VMEM scratch across the class-chunk axis; finalizes the
    per-sample loss on the last chunk with a lane-dense (1, 1, TN) store.
    """
    j = pl.program_id(1)

    @pl.when(j == 0)
    def _init():
        m_sc[...] = jnp.full_like(m_sc, -jnp.inf)
        l_sc[...] = jnp.zeros_like(l_sc)
        xy_sc[...] = jnp.zeros_like(xy_sc)

    x = x_ref[...].astype(jnp.float32)                       # (TN, TC)
    t = t_ref[...]                                           # (TN, 1) int32

    col = jax.lax.broadcasted_iota(jnp.int32, x.shape, 1)    # local class idx
    if chunked:
        col = col + j * tc                                   # global class idx
    if need_mask:
        # last chunk may read past C: neutralize padded columns
        x = jnp.where(col < c_total, x, _NEG)

    # online logsumexp along the class (lane) axis
    m_prev = m_sc[...]
    m_new = jnp.maximum(m_prev, jnp.max(x, axis=1, keepdims=True))
    alpha = jnp.exp(m_prev - m_new)
    l_sc[...] = alpha * l_sc[...] + jnp.sum(jnp.exp(x - m_new),
                                            axis=1, keepdims=True)
    m_sc[...] = m_new

    # gather x[n, y_n] with compare+select (no dynamic gather, no 0 * inf)
    xy_sc[...] = xy_sc[...] + jnp.sum(jnp.where(col == t, x, 0.0),
                                      axis=1, keepdims=True)

    @pl.when(j == pl.num_programs(1) - 1)
    def _finalize():
        lse = m_sc[...] + jnp.log(l_sc[...])                 # (TN, 1)
        loss = -wy_ref[...] * (xy_sc[...] - lse)             # (TN, 1)
        loss_ref[0, 0, :] = loss[:, 0]                       # lane-dense store


def _choose_tiles(n, c, itemsize):
    """Pick (row-tile TN, class-chunk TC), sized by bytes.

    Working set per element ≈ double-buffered input + ~4 f32 chunk-wide
    temporaries.  The class axis stays whole (TC == C, single chunk) unless a
    128-row tile would not fit the budget; then it is chunked into
    lane-aligned pieces and the online-logsumexp path is used.
    """
    budget = 24 * 1024 * 1024
    per_elem = 2 * itemsize + 4 * 4

    tc = c
    if 128 * c * per_elem > budget:          # can't fit 128 rows: chunk C
        tc = (budget // (128 * per_elem)) // 128 * 128
        tc = max(128, min(tc, 8192))

    tn = budget // max(tc * per_elem, 1)
    tn = (tn // 128) * 128 if tn >= 128 else max(8, (tn // 8) * 8)
    tn = min(tn, 8192)

    if tn >= n and n >= 256:
        # >=2 "parallel" row tiles so both v7x TensorCores are busy
        tn = ((n + 1) // 2 + 127) // 128 * 128
    return tn, tc


def _finalize_tile_rows(tn, n):
    tn = int(tn)
    if tn >= n:
        return n                              # single tile == full rows
    return max(8, (tn // 8) * 8)


def _finalize_tile_cols(tc, c):
    tc = max(128, (int(tc) // 128) * 128)
    return c if tc >= c else tc


def cross_entropy(logits, targets, weight=None, reduction="mean",
                  tile_rows=None, tile_cols=None):
    """Pallas impl of F.nll_loss(F.log_softmax(x, 1), y, weight, reduction)."""
    N, C = logits.shape
    itemsize = jnp.dtype(logits.dtype).itemsize

    auto_tn, auto_tc = _choose_tiles(N, C, itemsize)
    tn = _finalize_tile_rows(auto_tn if tile_rows is None else tile_rows, N)
    tc = _finalize_tile_cols(auto_tc if tile_cols is None else tile_cols, C)

    num_row_tiles = pl.cdiv(N, tn)
    num_col_chunks = pl.cdiv(C, tc)
    chunked = num_col_chunks > 1
    need_mask = (num_col_chunks * tc) != C

    # Per-sample class weight gathered once in the wrapper (N-element gather
    # from a C-vector); invalid / out-of-range targets -> weight 0 -> loss 0.
    if weight is None:
        w = jnp.ones((C,), dtype=jnp.float32)
    else:
        w = jnp.asarray(weight, dtype=jnp.float32).reshape(C)
    t = targets.astype(jnp.int32).reshape(N)
    valid = (t >= 0) & (t < C)
    wy = jnp.where(valid, jnp.take(w, jnp.clip(t, 0, C - 1)), 0.0)
    wy = wy.astype(jnp.float32)

    kernel = functools.partial(_cross_entropy_kernel, tc=tc, c_total=C,
                               chunked=chunked, need_mask=need_mask)

    n_pad = num_row_tiles * tn
    c_pad = num_col_chunks * tc
    cost = pl.CostEstimate(
        flops=5 * n_pad * c_pad,
        transcendentals=n_pad * c_pad,
        bytes_accessed=n_pad * c_pad * itemsize + 3 * n_pad * 4,
    )

    per_loss = pl.pallas_call(
        kernel,
        grid=(num_row_tiles, num_col_chunks),
        out_shape=jax.ShapeDtypeStruct((num_row_tiles, 1, tn), jnp.float32),
        in_specs=[
            pl.BlockSpec((tn, tc), lambda i, j: (i, j)),   # logits (pipelined)
            pl.BlockSpec((tn, 1), lambda i, j: (i, 0)),    # targets
            pl.BlockSpec((tn, 1), lambda i, j: (i, 0)),    # per-sample weights
        ],
        out_specs=pl.BlockSpec((1, 1, tn), lambda i, j: (i, 0, 0)),
        scratch_shapes=[
            pltpu.VMEM((tn, 1), jnp.float32),   # running max m
            pltpu.VMEM((tn, 1), jnp.float32),   # running sum-exp l
            pltpu.VMEM((tn, 1), jnp.float32),   # gathered target logit x_y
        ],
        compiler_params=pltpu.CompilerParams(
            dimension_semantics=("parallel", "arbitrary"),
            vmem_limit_bytes=48 * 1024 * 1024,
        ),
        cost_estimate=cost,
    )(logits, t.reshape(N, 1), wy.reshape(N, 1))

    per_loss = per_loss.reshape(n_pad)[:N]

    if reduction == "none":
        return per_loss
    elif reduction == "sum":
        return jnp.sum(per_loss)
    elif reduction == "mean":
        # TODO(synk): PyTorch raises if sum(wy)==0; here this yields NaN (0/0).
        return jnp.sum(per_loss) / jnp.sum(wy)
    else:
        raise ValueError(f"unknown reduction: {reduction}")


if __name__ == "__main__":
    key = jax.random.PRNGKey(0)
    k_x, k_t, k_w, k_x2, k_t2 = jax.random.split(key, 5)

    # --- small-C path: single class chunk, ragged batch, forced multi-tile ---
    N, C = 20, 32
    x = jax.random.normal(k_x, (N, C), dtype=jnp.float32)
    y = jax.random.randint(k_t, (N,), 0, C, dtype=jnp.int32)
    w = 0.5 + jax.random.uniform(k_w, (C,), dtype=jnp.float32)

    loss_mean = cross_entropy(x, y, weight=w, reduction="mean", tile_rows=8)
    loss_sum = cross_entropy(x, y, weight=w, reduction="sum", tile_rows=8)
    loss_none = cross_entropy(x, y, weight=None, reduction="none", tile_rows=8)
    # bf16 logits, auto tile (single full-row tile, no padding at all)
    loss_mean_bf16 = cross_entropy(x.astype(jnp.bfloat16), y, weight=w,
                                   reduction="mean")

    # --- chunked class axis (online logsumexp) with a ragged last chunk ---
    N2, C2 = 16, 300
    x2 = jax.random.normal(k_x2, (N2, C2), dtype=jnp.float32)
    y2 = jax.random.randint(k_t2, (N2,), 0, C2, dtype=jnp.int32)
    loss2 = cross_entropy(x2, y2, weight=None, reduction="mean",
                          tile_rows=8, tile_cols=128)

    jax.block_until_ready((loss_mean, loss_sum, loss_none,
                           loss_mean_bf16, loss2))

    # references in plain JAX
    logp = jax.nn.log_softmax(x, axis=1)
    picked = logp[jnp.arange(N), y]
    wy_ref = w[y]
    ref_mean = jnp.sum(-wy_ref * picked) / jnp.sum(wy_ref)
    ref_sum = jnp.sum(-wy_ref * picked)
    ref_none = -picked

    logp_bf = jax.nn.log_softmax(x.astype(jnp.bfloat16).astype(jnp.float32),
                                 axis=1)
    picked_bf = logp_bf[jnp.arange(N), y]
    ref_mean_bf16 = jnp.sum(-wy_ref * picked_bf) / jnp.sum(wy_ref)

    logp2 = jax.nn.log_softmax(x2, axis=1)
    ref2 = jnp.mean(-logp2[jnp.arange(N2), y2])

    assert jnp.allclose(loss_mean, ref_mean, rtol=1e-5, atol=1e-5)
    assert jnp.allclose(loss_sum, ref_sum, rtol=1e-5, atol=1e-5)
    assert jnp.allclose(loss_none, ref_none, rtol=1e-5, atol=1e-5)
    assert jnp.allclose(loss_mean_bf16, ref_mean_bf16, rtol=1e-4, atol=1e-4)
    assert jnp.allclose(loss2, ref2, rtol=1e-5, atol=1e-5)

    print("KERNEL_OK")
</pallas_src>

<mosaic_0001>
module attributes {stable_mosaic.version = 11 : i64} {
  func.func @_cross_entropy_kernel(%arg0: i32, %arg1: i32, %arg2: memref<8x32xf32, #tpu.memory_space<vmem>>, %arg3: memref<8x1xi32, #tpu.memory_space<vmem>>, %arg4: memref<8x1xf32, #tpu.memory_space<vmem>>, %arg5: memref<1x1x8xf32, #tpu.memory_space<vmem>>, %arg6: memref<8x1xf32, #tpu.memory_space<vmem>>, %arg7: memref<8x1xf32, #tpu.memory_space<vmem>>, %arg8: memref<8x1xf32, #tpu.memory_space<vmem>>) attributes {dimension_semantics = [#tpu.dimension_semantics<parallel>, #tpu.dimension_semantics<arbitrary>], iteration_bounds = array<i64: 3, 1>, scalar_prefetch = 0 : i64, scratch_operands = 3 : i64, tpu.core_type = #tpu.core_type<tc>, window_params = [{transform_indices = @transform_0, window_bounds = array<i64: 8, 32>}, {transform_indices = @transform_1, window_bounds = array<i64: 8, 1>}, {transform_indices = @transform_2, window_bounds = array<i64: 8, 1>}, {transform_indices = @transform_3, window_bounds = array<i64: 1, 1, 8>}]} {
    %c0_i32 = arith.constant 0 : i32
    %0 = arith.cmpi eq, %arg1, %c0_i32 : i32
    %1 = arith.extui %0 : i1 to i32
    %c0_i32_0 = arith.constant 0 : i32
    %2 = arith.cmpi ne, %1, %c0_i32_0 : i32
    scf.if %2 {
      %cst_21 = arith.constant 0xFF800000 : f32
      %34 = vector.broadcast %cst_21 : f32 to vector<8x1xf32>
      %c0_22 = arith.constant 0 : index
      %c0_23 = arith.constant 0 : index
      %35 = vector.load %arg6[%c0_22, %c0_23] : memref<8x1xf32, #tpu.memory_space<vmem>>, vector<8x1xf32>
      tpu.vector_store %arg6[%c0_22, %c0_23], %34 {strides = array<i32>} : memref<8x1xf32, #tpu.memory_space<vmem>>, vector<8x1xf32>,
      %cst_24 = arith.constant 0.000000e+00 : f32
      %36 = vector.broadcast %cst_24 : f32 to vector<8x1xf32>
      %c0_25 = arith.constant 0 : index
      %c0_26 = arith.constant 0 : index
      %37 = vector.load %arg7[%c0_25, %c0_26] : memref<8x1xf32, #tpu.memory_space<vmem>>, vector<8x1xf32>
      tpu.vector_store %arg7[%c0_25, %c0_26], %36 {strides = array<i32>} : memref<8x1xf32, #tpu.memory_space<vmem>>, vector<8x1xf32>,
      %cst_27 = arith.constant 0.000000e+00 : f32
      %38 = vector.broadcast %cst_27 : f32 to vector<8x1xf32>
      %c0_28 = arith.constant 0 : index
      %c0_29 = arith.constant 0 : index
      %39 = vector.load %arg8[%c0_28, %c0_29] : memref<8x1xf32, #tpu.memory_space<vmem>>, vector<8x1xf32>
      tpu.vector_store %arg8[%c0_28, %c0_29], %38 {strides = array<i32>} : memref<8x1xf32, #tpu.memory_space<vmem>>, vector<8x1xf32>,
    } else {
    }
    %c0 = arith.constant 0 : index
    %c0_1 = arith.constant 0 : index
    %3 = vector.load %arg2[%c0, %c0_1] : memref<8x32xf32, #tpu.memory_space<vmem>>, vector<8x32xf32>
    %c0_2 = arith.constant 0 : index
    %c0_3 = arith.constant 0 : index
    %4 = vector.load %arg3[%c0_2, %c0_3] : memref<8x1xi32, #tpu.memory_space<vmem>>, vector<8x1xi32>
    %5 = tpu.iota {dimensions = array<i32: 1>} : vector<8x32xi32>
    %c0_4 = arith.constant 0 : index
    %c0_5 = arith.constant 0 : index
    %6 = vector.load %arg6[%c0_4, %c0_5] : memref<8x1xf32, #tpu.memory_space<vmem>>, vector<8x1xf32>
    %cst = arith.constant dense<0xFF800000> : vector<8xf32>
    %7 = vector.multi_reduction <maximumf>, %3, %cst [1] : vector<8x32xf32> to vector<8xf32>
    %8 = vector.shape_cast %7 : vector<8xf32> to vector<8x1xf32>
    %9 = arith.maximumf %6, %8 : vector<8x1xf32>
    %10 = arith.subf %6, %9 : vector<8x1xf32>
    %11 = math.exp %10 : vector<8x1xf32>
    %c0_6 = arith.constant 0 : index
    %c0_7 = arith.constant 0 : index
    %12 = vector.load %arg7[%c0_6, %c0_7] : memref<8x1xf32, #tpu.memory_space<vmem>>, vector<8x1xf32>
    %13 = arith.mulf %11, %12 : vector<8x1xf32>
    %14 = vector.broadcast %9 : vector<8x1xf32> to vector<8x32xf32>
    %15 = arith.subf %3, %14 : vector<8x32xf32>
    %16 = math.exp %15 : vector<8x32xf32>
    %cst_8 = arith.constant dense<0.000000e+00> : vector<8xf32>
    %17 = vector.multi_reduction <add>, %16, %cst_8 [1] : vector<8x32xf32> to vector<8xf32>
    %18 = vector.shape_cast %17 : vector<8xf32> to vector<8x1xf32>
    %19 = arith.addf %13, %18 : vector<8x1xf32>
    %c0_9 = arith.constant 0 : index
    %c0_10 = arith.constant 0 : index
    %20 = vector.load %arg7[%c0_9, %c0_10] : memref<8x1xf32, #tpu.memory_space<vmem>>, vector<8x1xf32>
    tpu.vector_store %arg7[%c0_9, %c0_10], %19 {strides = array<i32>} : memref<8x1xf32, #tpu.memory_space<vmem>>, vector<8x1xf32>,
    %c0_11 = arith.constant 0 : index
    %c0_12 = arith.constant 0 : index
    %21 = vector.load %arg6[%c0_11, %c0_12] : memref<8x1xf32, #tpu.memory_space<vmem>>, vector<8x1xf32>
    tpu.vector_store %arg6[%c0_11, %c0_12], %9 {strides = array<i32>} : memref<8x1xf32, #tpu.memory_space<vmem>>, vector<8x1xf32>,
    %c0_13 = arith.constant 0 : index
    %c0_14 = arith.constant 0 : index
    %22 = vector.load %arg8[%c0_13, %c0_14] : memref<8x1xf32, #tpu.memory_space<vmem>>, vector<8x1xf32>
    %23 = vector.broadcast %4 : vector<8x1xi32> to vector<8x32xi32>
    %24 = arith.cmpi eq, %5, %23 : vector<8x32xi32>
    %cst_15 = arith.constant 0.000000e+00 : f32
    %25 = vector.broadcast %cst_15 : f32 to vector<8x32xf32>
    %26 = arith.select %24, %3, %25 : vector<8x32xi1>, vector<8x32xf32>
    %cst_16 = arith.constant dense<0.000000e+00> : vector<8xf32>
    %27 = vector.multi_reduction <add>, %26, %cst_16 [1] : vector<8x32xf32> to vector<8xf32>
    %28 = vector.shape_cast %27 : vector<8xf32> to vector<8x1xf32>
    %29 = arith.addf %22, %28 : vector<8x1xf32>
    %c0_17 = arith.constant 0 : index
    %c0_18 = arith.constant 0 : index
    %30 = vector.load %arg8[%c0_17, %c0_18] : memref<8x1xf32, #tpu.memory_space<vmem>>, vector<8x1xf32>
    tpu.vector_store %arg8[%c0_17, %c0_18], %29 {strides = array<i32>} : memref<8x1xf32, #tpu.memory_space<vmem>>, vector<8x1xf32>,
    %c0_i32_19 = arith.constant 0 : i32
    %31 = arith.cmpi eq, %arg1, %c0_i32_19 : i32
    %32 = arith.extui %31 : i1 to i32
    %c0_i32_20 = arith.constant 0 : i32
    %33 = arith.cmpi ne, %32, %c0_i32_20 : i32
    scf.if %33 {
      %c0_21 = arith.constant 0 : index
      %c0_22 = arith.constant 0 : index
      %34 = vector.load %arg6[%c0_21, %c0_22] : memref<8x1xf32, #tpu.memory_space<vmem>>, vector<8x1xf32>
      %c0_23 = arith.constant 0 : index
      %c0_24 = arith.constant 0 : index
      %35 = vector.load %arg7[%c0_23, %c0_24] : memref<8x1xf32, #tpu.memory_space<vmem>>, vector<8x1xf32>
      %36 = math.log %35 : vector<8x1xf32>
      %37 = arith.addf %34, %36 : vector<8x1xf32>
      %c0_25 = arith.constant 0 : index
      %c0_26 = arith.constant 0 : index
      %38 = vector.load %arg4[%c0_25, %c0_26] : memref<8x1xf32, #tpu.memory_space<vmem>>, vector<8x1xf32>
      %cst_27 = arith.constant 0.000000e+00 : f32
      %39 = vector.broadcast %cst_27 : f32 to vector<8x1xf32>
      %40 = arith.subf %39, %38 : vector<8x1xf32>
      %c0_28 = arith.constant 0 : index
      %c0_29 = arith.constant 0 : index
      %41 = vector.load %arg8[%c0_28, %c0_29] : memref<8x1xf32, #tpu.memory_space<vmem>>, vector<8x1xf32>
      %42 = arith.subf %41, %37 : vector<8x1xf32>
      %43 = arith.mulf %40, %42 : vector<8x1xf32>
      %44 = vector.shape_cast %43 : vector<8x1xf32> to vector<8xf32>
      %c0_30 = arith.constant 0 : index
      %c0_31 = arith.constant 0 : index
      %c0_32 = arith.constant 0 : index
      %45 = vector.load %arg5[%c0_30, %c0_31, %c0_32] : memref<1x1x8xf32, #tpu.memory_space<vmem>>, vector<1x1x8xf32>
      %46 = vector.shape_cast %45 : vector<1x1x8xf32> to vector<8xf32>
      %47 = vector.shape_cast %44 : vector<8xf32> to vector<1x1x8xf32>
      tpu.vector_store %arg5[%c0_30, %c0_31, %c0_32], %47 {strides = array<i32>} : memref<1x1x8xf32, #tpu.memory_space<vmem>>, vector<1x1x8xf32>,
    } else {
    }
    return
  }
  func.func @transform_0(%arg0: i32, %arg1: i32) -> (i32, i32) {
    %c0_i32 = arith.constant 0 : i32
    return %arg0, %arg1 : i32, i32
  }
  func.func @transform_1(%arg0: i32, %arg1: i32) -> (i32, i32) {
    %c0_i32 = arith.constant 0 : i32
    %c0_i32_0 = arith.constant 0 : i32
    return %arg0, %c0_i32 : i32, i32
  }
  func.func @transform_2(%arg0: i32, %arg1: i32) -> (i32, i32) {
    %c0_i32 = arith.constant 0 : i32
    %c0_i32_0 = arith.constant 0 : i32
    return %arg0, %c0_i32 : i32, i32
  }
  func.func @transform_3(%arg0: i32, %arg1: i32) -> (i32, i32, i32) {
    %c0_i32 = arith.constant 0 : i32
    %c0_i32_0 = arith.constant 0 : i32
    %c0_i32_1 = arith.constant 0 : i32
    return %arg0, %c0_i32, %c0_i32_0 : i32, i32, i32
  }
}

</mosaic_0001>

<bundles_post_ra>
// kernel: tpu_custom_call.1
= control target key start
LH: loop header
LB: loop body
LE: loop exit
PB: predicated region body
PF: predicated region fallthrough
CT: control target
= control target key end

     0   :  { %8 = vsyncpa [#allocation6], 0  ;;  %s711_s0 = inlined_call_operand.vmem [shape: f32[20,32], index: 0, kind: input, shape index: {}]   ;;  %s712_s1 = inlined_call_operand.vmem [shape: s32[20,1], index: 1, kind: input, shape index: {}]   ;;  %s713_s2 = inlined_call_operand.vmem [shape: f32[20,1], index: 2, kind: input, shape index: {}]   ;;  %s714_s3 = inlined_call_operand.hbm [shape: f32[3,1,8], index: 3, kind: output, shape index: {}]  }
   0x1   :  { %10 = vsyncpa [#allocation6 + $0x1], 0  ;;  %s579_s12 = smov 0   ;;  %s581_s13 = smov 0  }
   0x2   :  { %s583_s14 = smov 0   ;;  %s585_s15 = smov 0  }
   0x3   :  { %s587_s16 = smov 0   ;;  %s589_s17 = smov 0  }
   0x4 LB: > { %s398_s18 = sadd.s32 4294967295, %s553_s17   ;;  %s399_s19 = sadd.s32 4294967294, %s553_s17   ;;  %s553_s17 = sphi %s589_s17, %s16_s17   ;;  %s549_s16 = sphi %s587_s16, %s721_s16   ;;  %s545_s15 = sphi %s585_s15, %s720_s15   ;;  %s541_s14 = sphi %s583_s14, %s719_s14   ;;  %s537_s13 = sphi %s581_s13, %s718_s13   ;;  %s533_s12 = sphi %s579_s12, %s717_s12  }
   0x5   : > { %s28_s20 = sadd.s32 1, %s549_s16  ;;  %s115_s21 = sadd.s32 1, %s541_s14 }
   0x6   : > { %p30_p0 = scmp.ge.s32.totalorder %s28_s20, 3  ;;  %p125_p1 = scmp.ne.s32.totalorder %s541_s14, %s537_s13 }
   0x7   : > { %p126_p2 = scmp.eq.s32.totalorder %s398_s18, 2  ;;  %p131_p3 = scmp.ne.s32.totalorder %s537_s13, %s533_s12 }
   0x8   : > { %s723_s20 = smov (%p30_p0, %s28_s20), 0  ;;  %p132_p5 = scmp.eq.s32.totalorder %s399_s19, 2 }
   0x9   : > { %p619_p4 = por %p126_p2, %p125_p1  ;;  %s112_s23 = ssub.s32 %s549_s16, %s723_s20 }
   0xa   : > { %p402_p6 = scmp.ge.s32.totalorder %s553_s17, 1  ;;  %p113_p7 = scmp.eq.s32.totalorder %s112_s23, 0 }
   0xb   : > { %p626_p8 = por %p132_p5, %p131_p3  ;;  %p174_p9 = scmp.lt.s32.totalorder %s553_s17, 4 }
   0xc   : > { %s632_s25 = scalar_select %p113_p7, %s541_s14, %s115_s21  }
   0xd   : > { %p175_p10 = pnand %p402_p6, %p174_p9 }
   0xe   : > { %p207_p11 = scmp.lt.s32.totalorder (!%p175_p10), %s545_s15, 2  ;;  %vm226_vm0 = vcmask (!%p175_p10), 7168   ;;  %v555_v0 = vmov (!%p175_p10), -inf   ;;  %vm235_vm1 = vcmask (!%p175_p10), 261120   ;;  %v556_v3 = vmov (!%p175_p10), 0   ;;  %s205_s10 = sand.u32 (!%p175_p10), 1, %s537_s13  }
   0xf   : > { %178 = sbr.rel (%p175_p10) target bundleno = 631 (0x277), region = 32  ;;  %227 = vst.msk [vmem:[#allocation2] sm:$0xff] (!%p175_p10), %vm226_vm0, %v555_v0  ;;  %467 = vset.pattern.permute.xlu0 (!%p175_p10), %v556_v3  ;;  %468 = vset.pattern.permute.xlu1 (!%p175_p10), %v556_v3  ;;  %v557_v5 = vmov (!%p175_p10), 0.0   ;;  %v232_v13 = vlaneseq (!%p175_p10)  ;;  %s406_s11 = sshll.u32 (!%p175_p10), %s545_s15, 4  ;;  %vm293_vm3 = vcmask (!%p175_p10), 57344  }
  0x10   : > { %228 = vst.msk [vmem:[#allocation3] sm:$0xff] (!%p175_p10), %vm226_vm0, %v557_v5  ;;  %229 = vst.msk [vmem:[#allocation4] sm:$0xff] (!%p175_p10), %vm226_vm0, %v557_v5  ;;  %s206_s18 = scalar_lea.vmem (!%p175_p10), [#allocation5], %s205_s10 }
  0x11   : > { %v233_v14 = vand.u32 (!%p175_p10), 127, %v232_v13  ;;  %v289_v39 = vshrl.u32 (!%p175_p10), %v232_v13, 7  ;;  %s308_s19 = sshll.u32 (!%p175_p10), %s206_s18, 4  ;;  %s666_s19 = int_to_ptr.vmem [resolvable:$true] %s308_s19 }
  0x12   : > { %s475_s28 = scalar_lea.vmem (!%p175_p10), %s666_s19, 16 }
  0x13   : > { %v290_v40 = vsub.s32 (!%p175_p10), %v233_v14, %v289_v39  ;;  %p476_p12 = scmp.ne.s32.totalorder (!%p175_p10), %s666_s19, %s475_s28 }
  0x15   : > { %p477_p13 = pnand (!%p175_p10), %p476_p12, %p619_p4 }
  0x16   : > { %s208_s26 = scalar_select %p207_p11, %s545_s15, 2  ;;  %v234_v6 = vld [vmem:[#allocation2] sm:$0xff] }
  0x17   : > { %v243_v22 = vld [vmem:[#allocation3] sm:$0xff]  ;;  %v260_v26 = vld [vmem:[#allocation4] sm:$0xff]  ;;  %p478_p0 = pneg %p477_p13  ;;  %s558_s15 = smov [#allocation5]  }
  0x18   : > { %s637_s27 = sshll.u32 %s208_s26, 3  ;;  %s664_s26 = scalar_lea.hbm %s714_s3, %s406_s11 }
  0x19   : > { %s213_s30 = scalar_lea.vmem %s711_s0, %s637_s27  ;;  %s217_s6 = scalar_lea.vmem %s712_s1, %s637_s27 }
  0x1a   : > { %v230_v1 = vld [vmem:[%s213_s30] sm:$0xff]  ;;  %s221_s9 = scalar_lea.vmem %s713_s2, %s637_s27  ;;  %s296_s27 = scalar_lea.sflag [#allocation6], %s205_s10 }
  0x1b   : > { %v236_v2 = vsel %vm235_vm1, %v230_v1, -inf  ;;  %v231_v4 = vld [vmem:[%s217_s6] sm:$0xff]  ;;  %s479_s29 = sshll.u32 %s558_s15, 4  ;;  %s480_s29 = int_to_ptr.vmem [resolvable:$false] %s479_s29 }
  0x1c   : > { %237 = vmax.xlane.f32.xlu0 %v236_v2  ;;  %262 = vperm.xlu1 %468, %v231_v4   ;;  %v279_v31 = vld [vmem:[%s221_s9] sm:$0xff]  ;;  %s481_s30 = scalar_lea.vmem %s480_s29, 32  ;;  %p482_p1 = scmp.lt.s32.totalorder %s666_s19, %s480_s29 }
  0x1d   : > { %v280_v36 = vsub.f32 0.0, %v279_v31  ;;  %p483_p2 = scmp.lt.s32.totalorder %s481_s30, %s475_s28 }
  0x1f   : > { %p484_p3 = por %p483_p2, %p482_p1 }
  0x21   : > { %p485_p5 = pnand %p484_p3, %p478_p0 }
  0x9b   : > { %v263_v15 = vpop.permute.xlu1 %262 }
  0x9c   : > { %vm264_vm2 = vcmp.eq.s32.totalorder %v233_v14, %v263_v15 }
  0x9d   : > { %v265_v17 = vsel %vm264_vm2, %v230_v1, 0.0 }
  0x9e   : > { %v266_v19 = vsel %vm235_vm1, %v265_v17, 0.0 }
  0xa9   : > { %v238_v7 = vpop.xlane.xlu0 %237 }
  0xaa   : > { %v239_v8 = vmax.f32 %v234_v6, %v238_v7 }
  0xac   : > { %v240_v9 = vsub.f32 %v234_v6, %v239_v8  ;;  %259 = vst.msk [vmem:[#allocation2] sm:$0xff] %vm226_vm0, %v239_v8  ;;  %247 = vperm.xlu0 %467, %v239_v8  }
  0xae   : > { %v241_v20 = vmul.f32 1.442695, %v240_v9 }
  0xb3   : > { %v274_v33 = vld [vmem:[#allocation2] sm:$0xff] }
 0x12b   : > { %v248_v10 = vpop.permute.xlu0 %247 }
 0x12c   : > { %v250_v11 = vsub.f32 %v230_v1, %v248_v10 }
 0x12e   : > { %v251_v12 = vmul.f32 1.442695, %v250_v11 }
 0x130   : > { %469 = vpow2.f32 %v251_v12 }
 0x131   : > { %471 = vpow2.f32 %v241_v20 }
 0x13a   : > { %v470_v16 = vpop.eup %469 }
 0x13b   : > { %v253_v18 = vsel %vm235_vm1, %v470_v16, 0.0  ;;  %v472_v21 = vpop.eup %471 }
 0x13c   : > { %254 = vadd.xlane.f32.xlu1 %v253_v18  ;;  %v244_v23 = vmul.f32 %v472_v21, %v243_v22 }
 0x140   : > { %267 = vadd.xlane.f32.xlu1 %v266_v19 }
 0x1c9   : > { %v255_v24 = vpop.xlane.xlu1 %254 }
 0x1ca   : > { %v256_v25 = vadd.f32 %v255_v24, %v244_v23 }
 0x1cc   : > { %258 = vst.msk [vmem:[#allocation3] sm:$0xff] %vm226_vm0, %v256_v25 }
 0x1cd   : > { %v268_v27 = vpop.xlane.xlu1 %267 }
 0x1ce   : > { %v269_v28 = vadd.f32 %v268_v27, %v260_v26 }
 0x1d0   : > { %270 = vst.msk [vmem:[#allocation4] sm:$0xff] %vm226_vm0, %v269_v28 }
 0x1d3   : > { %v275_v29 = vld [vmem:[#allocation3] sm:$0xff] }
 0x1d4   : > { %473 = vlog2.f32 %v275_v29 }
 0x1d7   : > { %v281_v34 = vld [vmem:[#allocation4] sm:$0xff] }
 0x1de   : > { %v474_v30 = vpop.eup %473 }
 0x1df   : > { %v277_v32 = vmul.f32 0.6931472, %v474_v30 }
 0x1e1   : > { %v278_v35 = vadd.f32 %v277_v32, %v274_v33 }
 0x1e3   : > { %v282_v37 = vsub.f32 %v281_v34, %v278_v35 }
 0x1e5   : > { %v283_v38 = vmul.f32 %v282_v37, %v280_v36 }
 0x1e7   : > { %286 = vperm.xlu1 %468, %v283_v38  }
 0x266   : > { %v287_v41 = vpop.permute.xlu1 %286 }
 0x267   : > { %v291_v42 = vrot.slane %v287_v41, %v290_v40 }
 0x269   : > { %294 = vst.msk [vmem:[%s206_s18] sm:$0x1] %vm293_vm3, %v291_v42 }
 0x26a   : > { %488 = shalt.err (!%p485_p5)
}
 0x26b   : > { %s489_s4 = scalar_lea.hbm %s664_s26, 16  ;;  %s493_s7 = scalar_lea.hbm %s714_s3, 48 }
 0x26c   : > { %p490_p6 = scmp.ne.s32.totalorder %s664_s26, %s489_s4  ;;  %p494_p10 = scmp.lt.u32.totalorder %s664_s26, %s714_s3 }
 0x26d   : > { %p495_p11 = scmp.lt.u32.totalorder %s493_s7, %s489_s4  ;;  %p497_p13 = scmp.lt.u32.totalorder %s489_s4, %s664_s26 }
 0x26e   : > { %p491_p7 = pnand %p490_p6, %p619_p4 }
 0x26f   : > { %p496_p12 = por %p495_p11, %p494_p10 }
 0x270   : > { %p492_p9 = pneg %p491_p7 }
 0x271   : > { %p498_p0 = por %p497_p13, %p496_p12 }
 0x273   : > { %p499_p1 = pnand %p498_p0, %p492_p9 }
 0x275   : > { %502 = shalt.err (!%p499_p1)
}
 0x276   : > { %409 = dma.vmem_to_hbm [thread:$0]  (%p619_p4), %s666_s19, 16, %s664_s26, %s296_s27  }
 0x277 PF: > { %p415_p2 = scmp.ge.s32.totalorder %s553_s17, 2  ;;  %s320_s10 = sand.u32 1, %s533_s12  }
 0x278   : > { %s321_s11 = scalar_lea.sflag [#allocation6], %s320_s10 }
 0x279   : > { %p412_p3 = pnand %p415_p2, %p626_p8 }
 0x27b   : > { %528 = dma.done.wait (!%p412_p3), %s321_s11, 16  }
 0x27c   : > { %530 = vsyncadd (!%p412_p3), %s321_s11, 4294967280  ;;  %s16_s17 = sadd.s32 1, %s553_s17   ;;  %s717_s12 = smov %s537_s13 }
 0x27d   : > { %p13_p5 = scmp.ge.s32.totalorder %s16_s17, 5   ;;  %s718_s13 = smov %s541_s14 }
 0x27e   : > { %s719_s14 = smov %s632_s25  ;;  %s720_s15 = smov %s549_s16 }
 0x27f   : > { %s721_s16 = smov %s723_s20  ;;  %15 = sbr.rel (!%p13_p5) target bundleno = 4 (0x4), region = 81 }
 0x286   :  { %325 = vsyncpa [#allocation6], 1 }
 0x287   :  { %327 = vsyncpa [#allocation6 + $0x1], 1 }

</bundles_post_ra>
